<compile_context>
chip_gen: v6e
topology: v6e:2x2x1
jax: 0.10.0
libtpu: 0.0.40
codegen_flags: <defaults>
</compile_context>

<pallas_src>
import jax
import jax.numpy as jnp
import numpy as np
from jax import lax
from jax.experimental import pallas as pl
from jax.experimental.pallas import tpu as pltpu


def _conv_as_matmul_kernel(w_ref, x_ref, o_ref):
    # w_ref: (Cout, K)     bf16, K = 9*Cin  (grid-invariant block, reused from VMEM)
    # x_ref: (1, K, T)     bf16, T = HW tile (lane-dense)
    # o_ref: (1, Cout, T)  f32               (lane-dense, unmasked stores)
    o_ref[0] = jnp.dot(w_ref[...], x_ref[0], preferred_element_type=jnp.float32)


def _pick_hw_tile(hw):
    # Largest lane-dense tile (multiple of 128, <= 1024) dividing HW, preferring
    # at least 2 tiles so the pipeline has something to overlap; fall back to the
    # full axis for small/odd HW (block == full dim is always legal).
    for t in (1024, 512, 256, 128):
        if hw % t == 0 and hw // t >= 2:
            return t
    for t in (1024, 512, 256, 128):
        if hw % t == 0:
            return t
    return hw


def pixel_shuffle_nchw(y, r=2):
    """PyTorch PixelShuffle(r) in NCHW: (B, C*r*r, H, W) -> (B, C, H*r, W*r)."""
    B, Crr, H, W = y.shape
    C = Crr // (r * r)
    y = y.reshape(B, C, r, r, H, W)            # [b, c, i, j, h, w]
    y = jnp.transpose(y, (0, 1, 4, 2, 5, 3))   # (B, C, H, r, W, r)
    return y.reshape(B, C, H * r, W * r)


def upsample_forward(x_nchw, w_oihw):
    """Full module forward. x_nchw: (B, n_feat, H, W); w_oihw: (2*n_feat, n_feat, 3, 3)."""
    B, Cin, H, W = x_nchw.shape
    Cout = w_oihw.shape[0]
    HW = H * W
    K = 9 * Cin

    # im2col, paid once, already in the transposed (channels-on-sublanes,
    # HW-on-lanes) layout the kernel consumes.  Tap order: kh-major, kw-minor.
    xp = jnp.pad(x_nchw, ((0, 0), (0, 0), (1, 1), (1, 1)))
    taps = [xp[:, :, kh:kh + H, kw:kw + W].reshape(B, Cin, HW)
            for kh in range(3) for kw in range(3)]
    patches = jnp.concatenate(taps, axis=1).astype(jnp.bfloat16)          # (B, 9*Cin, HW)

    # (Cout, Cin, 3, 3) -> (Cout, 3, 3, Cin) -> (Cout, 9*Cin); matches patch ordering.
    w2 = jnp.transpose(w_oihw, (0, 2, 3, 1)).reshape(Cout, K).astype(jnp.bfloat16)

    T = _pick_hw_tile(HW)
    grid = (B, HW // T)

    y = pl.pallas_call(
        _conv_as_matmul_kernel,
        out_shape=jax.ShapeDtypeStruct((B, Cout, HW), jnp.float32),
        grid_spec=pltpu.PrefetchScalarGridSpec(
            num_scalar_prefetch=0,
            grid=grid,
            in_specs=[
                pl.BlockSpec((Cout, K), lambda b, t: (0, 0)),     # weights (invariant)
                pl.BlockSpec((1, K, T), lambda b, t: (b, 0, t)),  # im2col tile
            ],
            out_specs=pl.BlockSpec((1, Cout, T), lambda b, t: (b, 0, t)),
        ),
        compiler_params=pltpu.CompilerParams(
            dimension_semantics=("parallel", "parallel"),
            vmem_limit_bytes=32 * 1024 * 1024,
        ),
    )(w2, patches)

    y = y.reshape(B, Cout, H, W)               # already NCHW
    return pixel_shuffle_nchw(y, r=2)


def upsample_reference(x_nchw, w_oihw):
    """Pure-JAX f32 reference (lax conv + identical pixel shuffle)."""
    y = lax.conv_general_dilated(
        x_nchw, w_oihw, window_strides=(1, 1), padding=((1, 1), (1, 1)),
        dimension_numbers=("NCHW", "OIHW", "NCHW"))
    return pixel_shuffle_nchw(y, r=2)


if __name__ == "__main__":
    B, n_feat, H, W = 2, 4, 16, 16
    key = jax.random.PRNGKey(0)
    kx, kw = jax.random.split(key)

    x = jax.random.normal(kx, (B, n_feat, H, W), dtype=jnp.float32)
    # Conv2d(n_feat, 2*n_feat, 3, bias=False) weight, deterministic init.
    w = jax.random.normal(kw, (2 * n_feat, n_feat, 3, 3), dtype=jnp.float32) * 0.1

    out = jax.block_until_ready(upsample_forward(x, w))
    ref = jax.block_until_ready(upsample_reference(x, w))

    assert out.shape == (B, n_feat // 2, 2 * H, 2 * W), out.shape
    # bf16 matmul inputs (f32 accumulation) vs f32 reference -> relaxed tolerance.
    np.testing.assert_allclose(np.asarray(out), np.asarray(ref), rtol=3e-2, atol=3e-2)
    print("KERNEL_OK")
</pallas_src>

<mosaic_0001>
module attributes {stable_mosaic.version = 11 : i64} {
  func.func @_conv_as_matmul_kernel(%arg0: i32, %arg1: i32, %arg2: memref<8x36xbf16, #tpu.memory_space<vmem>>, %arg3: memref<1x36x128xbf16, #tpu.memory_space<vmem>>, %arg4: memref<1x8x128xf32, #tpu.memory_space<vmem>>) attributes {dimension_semantics = [#tpu.dimension_semantics<parallel>, #tpu.dimension_semantics<parallel>], iteration_bounds = array<i64: 2, 2>, scalar_prefetch = 0 : i64, scratch_operands = 0 : i64, tpu.core_type = #tpu.core_type<tc>, window_params = [{pipeline_mode = #tpu.pipeline_mode<synchronous>, transform_indices = @transform_0, window_bounds = array<i64: 8, 36>}, {transform_indices = @transform_1, window_bounds = array<i64: 1, 36, 128>}, {transform_indices = @transform_2, window_bounds = array<i64: 1, 8, 128>}]} {
    %c0 = arith.constant 0 : index
    %c0_0 = arith.constant 0 : index
    %0 = vector.load %arg2[%c0, %c0_0] : memref<8x36xbf16, #tpu.memory_space<vmem>>, vector<8x36xbf16>
    %c0_1 = arith.constant 0 : index
    %c0_2 = arith.constant 0 : index
    %c0_3 = arith.constant 0 : index
    %1 = vector.load %arg3[%c0_1, %c0_2, %c0_3] : memref<1x36x128xbf16, #tpu.memory_space<vmem>>, vector<1x36x128xbf16>
    %2 = vector.shape_cast %1 : vector<1x36x128xbf16> to vector<36x128xbf16>
    %cst = arith.constant dense<0.000000e+00> : vector<8x128xf32>
    %3 = tpu.matmul %0, %2, %cst {dimension_numbers = #tpu.dot_dimension_numbers<[1], [0], [0], [1], [0, 0, 1, 1], [], []>} : vector<8x36xbf16>, vector<36x128xbf16>, vector<8x128xf32> -> vector<8x128xf32>
    %c0_4 = arith.constant 0 : index
    %c0_5 = arith.constant 0 : index
    %c0_6 = arith.constant 0 : index
    %4 = vector.load %arg4[%c0_4, %c0_5, %c0_6] : memref<1x8x128xf32, #tpu.memory_space<vmem>>, vector<1x8x128xf32>
    %5 = vector.shape_cast %4 : vector<1x8x128xf32> to vector<8x128xf32>
    %6 = vector.shape_cast %3 : vector<8x128xf32> to vector<1x8x128xf32>
    tpu.vector_store %arg4[%c0_4, %c0_5, %c0_6], %6 {strides = array<i32>} : memref<1x8x128xf32, #tpu.memory_space<vmem>>, vector<1x8x128xf32>,
    return
  }
  func.func @transform_0(%arg0: i32, %arg1: i32) -> (i32, i32) {
    %c0_i32 = arith.constant 0 : i32
    %c0_i32_0 = arith.constant 0 : i32
    %c0_i32_1 = arith.constant 0 : i32
    return %c0_i32, %c0_i32_0 : i32, i32
  }
  func.func @transform_1(%arg0: i32, %arg1: i32) -> (i32, i32, i32) {
    %c0_i32 = arith.constant 0 : i32
    %c0_i32_0 = arith.constant 0 : i32
    return %arg0, %c0_i32, %arg1 : i32, i32, i32
  }
  func.func @transform_2(%arg0: i32, %arg1: i32) -> (i32, i32, i32) {
    %c0_i32 = arith.constant 0 : i32
    %c0_i32_0 = arith.constant 0 : i32
    return %arg0, %c0_i32, %arg1 : i32, i32, i32
  }
}

</mosaic_0001>

<bundles_post_ra>
// kernel: tpu_custom_call.1
= control target key start
LH: loop header
LB: loop body
LE: loop exit
PB: predicated region body
PF: predicated region fallthrough
CT: control target
= control target key end

     0   :  { %7 = vsyncpa [#allocation4], 0  ;;  %s758_s0 = inlined_call_operand.vmem [shape: bf16[8,36], index: 0, kind: input, shape index: {}]   ;;  %s759_s1 = inlined_call_operand.vmem [shape: bf16[2,36,256], index: 1, kind: input, shape index: {}]   ;;  %s760_s2 = inlined_call_operand.hbm [shape: f32[2,8,256], index: 2, kind: output, shape index: {}]  }
   0x1   :  { %9 = vsyncpa [#allocation4 + $0x1], 0  ;;  %s607_s9 = smov 0   ;;  %s609_s10 = smov 0  }
   0x2   :  { %s611_s11 = smov 0   ;;  %s613_s12 = smov 0  }
   0x3   :  { %s615_s13 = smov 0   ;;  %s617_s14 = smov 0  }
   0x4   :  { %s619_s15 = smov 0   ;;  %s621_s16 = smov 0  }
   0x5 LB: > { %s386_s17 = sadd.s32 4294967295, %s587_s16   ;;  %s387_s18 = sadd.s32 4294967294, %s587_s16   ;;  %s587_s16 = sphi %s621_s16, %s15_s16   ;;  %s583_s15 = sphi %s619_s15, %s770_s15   ;;  %s579_s14 = sphi %s617_s14, %s769_s14   ;;  %s575_s13 = sphi %s615_s13, %s768_s13   ;;  %s571_s12 = sphi %s613_s12, %s767_s12   ;;  %s567_s11 = sphi %s611_s11, %s766_s11   ;;  %s563_s10 = sphi %s609_s10, %s765_s10   ;;  %s559_s9 = sphi %s607_s9, %s764_s9  }
   0x6   : > { %s24_s19 = sadd.s32 1, %s579_s14  ;;  %s27_s20 = sadd.s32 1, %s583_s15 }
   0x7   : > { %p25_p0 = scmp.ge.s32.totalorder %s24_s19, 2  ;;  %p64_p1 = scmp.ne.s32.totalorder %s567_s11, %s563_s10 }
   0x8   : > { %p65_p2 = scmp.eq.s32.totalorder %s587_s16, 0  ;;  %p96_p5 = scmp.eq.s32.totalorder %s386_s17, 3 }
   0x9   : > { %s772_s19 = smov (%p25_p0, %s24_s19), 0  ;;  %s774_s20 = smov (!%p25_p0, %s27_s20), %s583_s15 }
   0xa   : > { %s53_s21 = ssub.s32 %s579_s14, %s772_s19  ;;  %p659_p3 = por %p65_p2, %p64_p1 }
   0xb   : > { %p29_p4 = scmp.ge.s32.totalorder %s774_s20, 2  ;;  %p101_p6 = scmp.ne.s32.totalorder %s563_s10, %s559_s9 }
   0xc   : > { %p102_p7 = scmp.eq.s32.totalorder %s387_s18, 3  ;;  %p667_p8 = por %p96_p5, %p64_p1 }
   0xd   : > { %s776_s20 = smov (%p29_p4, %s774_s20), 0  ;;  %s57_s27 = sadd.s32 1, %s567_s11 }
   0xe   : > { %p671_p9 = por %p102_p7, %p101_p6  ;;  %s52_s25 = ssub.s32 %s583_s15, %s776_s20 }
   0xf   : > { %s54_s26 = sor.u32 %s53_s21, %s52_s25  ;;  %p389_p11 = scmp.ge.s32.totalorder %s587_s16, 4 }
  0x10   : > { %p55_p10 = scmp.eq.s32.totalorder %s54_s26, 0 }
  0x11   : > { %121 = sbr.rel (%p389_p11) target bundleno = 32 (0x20), region = 20 }
  0x12   : > { %s679_s28 = scalar_select %p55_p10, %s567_s11, %s57_s27  }
  0x16   : > { %124 = sbr.rel (!%p659_p3) target bundleno = 32 (0x20), region = 24  ;;  %s126_s29 = sand.u32 (%p659_p3), 1, %s567_s11  }
  0x17   : > { %s417_s30 = smul.u32 (%p659_p3), 10, %s583_s15 }
  0x18   : > { %s416_s3 = smul.u32 (%p659_p3), 20, %s126_s29 }
  0x19   : > { %s130_s4 = sadd.s32 (%p659_p3), %s579_s14, %s417_s30 }
  0x1a   : > { %s390_s5 = sshll.u32 (%p659_p3), %s130_s4, 2  ;;  %s128_s17 = scalar_lea.vmem (%p659_p3), [#allocation2], %s416_s3 }
  0x1b   : > { %s132_s8 = scalar_lea.vmem %s759_s1, %s390_s5 }
  0x1c   : > { %v149_v0 = vld [vmem:[%s132_s8] sm:$0xf]  ;;  %v151_v1 = vld [vmem:[%s132_s8 + $0x8] sm:$0xf]  ;;  %v153_v2 = vld [vmem:[%s132_s8 + $0x10] sm:$0xf] }
  0x1d   : > { %150 = vst [vmem:[%s128_s17] sm:$0xf] %v149_v0  ;;  %152 = vst [vmem:[%s128_s17 + $0x4] sm:$0xf] %v151_v1  ;;  %v155_v3 = vld [vmem:[%s132_s8 + $0x18] sm:$0xf] }
  0x1e   : > { %154 = vst [vmem:[%s128_s17 + $0x8] sm:$0xf] %v153_v2  ;;  %v157_v4 = vld [vmem:[%s132_s8 + $0x20] sm:$0xf]  ;;  %156 = vst [vmem:[%s128_s17 + $0xc] sm:$0xf] %v155_v3 }
  0x1f   : > { %158 = vst [vmem:[%s128_s17 + $0x10] sm:$0xf] %v157_v4 }
  0x20 PF: > { %p391_p12 = scmp.ge.s32.totalorder %s587_s16, 1  ;;  %p191_p13 = scmp.lt.s32.totalorder %s587_s16, 5 }
  0x22   : > { %p192_p0 = pnand %p391_p12, %p191_p13 }
  0x23   : > { %s693_s18 = sand.u32 (!%p192_p0), 1, %s563_s10   ;;  %s398_s27 = sshll.u32 (!%p192_p0), %s575_s13, 1 }
  0x24   : > { %195 = sbr.rel (%p192_p0) target bundleno = 263 (0x107), region = 65  ;;  %s392_s29 = sshll.u32 (!%p192_p0), %s693_s18, 3 }
  0x25   : > { %s418_s21 = smul.u32 (!%p192_p0), 20, %s693_s18  ;;  %s302_s30 = sadd.s32 (!%p192_p0), %s571_s12, %s398_s27 }
  0x26   : > { %s218_s3 = scalar_lea.vmem (!%p192_p0), [#allocation3], %s392_s29  ;;  %s399_s5 = sshll.u32 (!%p192_p0), %s302_s30, 7 }
  0x27   : > { %s200_s22 = scalar_lea.vmem (!%p192_p0), [#allocation2], %s418_s21  ;;  %s306_s4 = sshll.u32 (!%p192_p0), %s218_s3, 4  ;;  %s702_s4 = int_to_ptr.vmem [resolvable:$true] %s306_s4 }
  0x28   : > { %s707_s8 = scalar_lea.hbm (!%p192_p0), %s760_s2, %s399_s5  ;;  %s291_s17 = scalar_lea.sflag (!%p192_p0), [#allocation4], %s693_s18 }
  0x29   : > { %v589_v5 = vmov 0.0   ;;  %vm590_vm0 = vmmov 0   ;;  %vm245_vm1 = vcmask 1041408   ;;  %v492_v6 = vld [vmem:[%s200_s22 + $0x10] ss:$0 sps:$4 sm:$0x33]  }
  0x2a   : > { %406 = vmatprep.subr.bf16.mxu0 %v589_v5  ;;  %412 = vmatprep.mubr.msk.bf16.mxu0 %vm590_vm0, %v589_v5  ;;  %v247_v7 = vsel %vm245_vm1, %v492_v6, 0  ;;  %v493_v8 = vld [vmem:[%s200_s22 + $0x8] sm:$0xff]   ;;  %v494_v9 = vld [vmem:[%s200_s22] sm:$0xff]   ;;  %vm241_vm2 = vcmask 293888   ;;  %s495_s13 = scalar_lea.vmem %s702_s4, 128  ;;  %s591_s12 = smov [#allocation3]  }
  0x2b   : > { %407 = vmatpush3.bf16.msra.mxu0 %v247_v7  ;;  %v220_v10 = vld [vmem:[%s758_s0] sm:$0xf]  ;;  %p496_p1 = scmp.ne.s32.totalorder %s702_s4, %s495_s13  ;;  %s499_s21 = sshll.u32 %s591_s12, 4  ;;  %s500_s21 = int_to_ptr.vmem [resolvable:$false] %s499_s21 }
  0x2c   : > { %408 = vmatprep.subr.bf16.mxu0 %v589_v5  ;;  %s501_s22 = scalar_lea.vmem %s500_s21, 256  ;;  %p502_p4 = scmp.lt.s32.totalorder %s702_s4, %s500_s21 }
  0x2d   : > { %p497_p2 = pnand %p496_p1, %p667_p8  ;;  %p503_p5 = scmp.lt.s32.totalorder %s501_s22, %s495_s13 }
  0x2f   : > { %409 = vmatpush3.bf16.msra.mxu0 %v493_v8  ;;  %p498_p3 = pneg %p497_p2  ;;  %p504_p6 = por %p503_p5, %p502_p4 }
  0x30   : > { %410 = vmatprep.subr.bf16.mxu0 %v589_v5 }
  0x31   : > { %p505_p7 = pnand %p504_p6, %p498_p3 }
  0x33   : > { %411 = vmatpush3.bf16.msra.mxu0 %v494_v9 }
  0x36   : > { %413 = vmatmul.mubr.msk.bf16.vlgmr.msra.gmra.mxu0 %vm241_vm2, %v220_v10 }
  0xf6   : > { %v283_v11 = vpop.f32.mrf.mxu0 }
  0xf7   : > { %289 = vst [vmem:[%s218_s3] sm:$0xff] %v283_v11 }
  0xf8   : > { %v414_v12 = vpop.f32.mrf.mxu0 }
  0xf9   : > { %508 = shalt.err (!%p505_p7)
}
  0xfa   : > { %s509_s25 = scalar_lea.hbm %s707_s8, 128  ;;  %s513_s27 = scalar_lea.hbm %s760_s2, 512 }
  0xfb   : > { %p510_p10 = scmp.ne.s32.totalorder %s707_s8, %s509_s25  ;;  %p514_p13 = scmp.lt.s32.totalorder %s707_s8, %s760_s2 }
  0xfc   : > { %p515_p0 = scmp.lt.s32.totalorder %s513_s27, %s509_s25 }
  0xfd   : > { %p511_p11 = pnand %p510_p10, %p667_p8 }
  0xfe   : > { %p516_p1 = por %p515_p0, %p514_p13 }
  0xff   : > { %p512_p12 = pneg %p511_p11 }
 0x101   : > { %p517_p2 = pnand %p516_p1, %p512_p12 }
 0x103   : > { %520 = shalt.err (!%p517_p2)
}
 0x104   : > { %419 = dma.vmem_to_hbm [thread:$0]  (%p667_p8), %s702_s4, 128, %s707_s8, %s291_s17   ;;  %v286_v13 = vpop.f32.mrf.mxu0 }
 0x106   : > { %v415_v14 = vpop.f32.mrf.mxu0 }
 0x107 PF: > { %p425_p3 = scmp.ge.s32.totalorder %s587_s16, 2  ;;  %s318_s3 = sand.u32 1, %s559_s9  }
 0x108   : > { %s319_s5 = scalar_lea.sflag [#allocation4], %s318_s3 }
 0x109   : > { %p422_p4 = pnand %p425_p3, %p671_p9 }
 0x10b   : > { %p423_p5 = pneg %p422_p4 }
 0x10d   : > { %554 = dma.done.wait (%p423_p5), %s319_s5, 128  }
 0x10e   : > { %556 = vsyncadd (%p423_p5), %s319_s5, 4294967168  ;;  %s15_s16 = sadd.s32 1, %s587_s16   ;;  %s764_s9 = smov %s563_s10 }
 0x10f   : > { %p12_p6 = scmp.ge.s32.totalorder %s15_s16, 6   ;;  %s765_s10 = smov %s567_s11 }
 0x110   : > { %s766_s11 = smov %s679_s28  ;;  %s767_s12 = smov %s579_s14 }
 0x111   : > { %s768_s13 = smov %s583_s15  ;;  %s769_s14 = smov %s772_s19 }
 0x112   : > { %s770_s15 = smov %s776_s20  ;;  %14 = sbr.rel (!%p12_p6) target bundleno = 5 (0x5), region = 109 }
 0x117   :  { %324 = vsyncpa [#allocation4], 1 }
 0x118   :  { %326 = vsyncpa [#allocation4 + $0x1], 1 }

</bundles_post_ra>
